<compile_context>
chip_gen: v6e
topology: v6e:2x2x1
jax: 0.10.0
libtpu: 0.0.40
codegen_flags: <defaults>
</compile_context>

<pallas_src>
import functools

import jax
import jax.numpy as jnp
from jax.experimental import pallas as pl
from jax.experimental.pallas import tpu as pltpu


def _round_up(x, m):
    return ((x + m - 1) // m) * m


# ----------------------------------------------------------------------------
# Fused MLP kernel: x -> [Linear (+ Sigmoid)] * num_layers, all in VMEM.
#   refs = (x_ref, w0_ref, b0_ref, w1_ref, b1_ref, ..., o_ref)
#   x_ref : (TM, IN_PAD)       bf16
#   wi_ref: (in_pad, out_pad)  bf16  (pre-transposed, zero-padded)
#   bi_ref: (1, out_pad)       f32   (zero-padded)
#   o_ref : (TM, OUT_PAD)      f32
# ----------------------------------------------------------------------------
def _fused_mlp_kernel(*refs, num_layers, apply_acts):
    x_ref = refs[0]
    o_ref = refs[-1]
    wb = refs[1:-1]

    h = x_ref[...]                                     # bf16 activations
    for i in range(num_layers):                        # unrolled at trace time
        w = wb[2 * i][...]                             # bf16 (in_pad, out_pad)
        b = wb[2 * i + 1][...]                         # f32  (1, out_pad)
        # MXU matmul: bf16 operands, f32 accumulation; bias folded into epilogue.
        y = jnp.dot(h, w, preferred_element_type=jnp.float32) + b
        if apply_acts[i]:
            # sigmoid(y) == 0.5 * tanh(0.5 * y) + 0.5  (single EUP op, f32)
            y = 0.5 * jnp.tanh(0.5 * y) + 0.5
        if i + 1 < num_layers:
            h = y.astype(jnp.bfloat16)                 # feed next MXU layer
        else:
            o_ref[...] = y.astype(o_ref.dtype)


def _fused_mlp_forward(x, weights, biases, apply_acts, out_features):
    """x: (B, in_features) f32.  weights[i]: bf16 (in_pad, out_pad), biases[i]: f32 (1, out_pad)."""
    B, in_f = x.shape
    in_pad = weights[0].shape[0]
    out_pad = weights[-1].shape[1]
    num_layers = len(weights)

    # Batch tiling: sublane-aligned; cap the tile so large batches get a grid
    # that can shard across v7x's two TensorCores.
    tm = min(128, _round_up(B, 8))
    b_pad = _round_up(B, tm)

    # Zero-pad x to (b_pad, in_pad) and cast matmul operand to bf16.
    xp = jnp.zeros((b_pad, in_pad), jnp.bfloat16)
    xp = xp.at[:B, :in_f].set(x.astype(jnp.bfloat16))

    kernel = functools.partial(
        _fused_mlp_kernel, num_layers=num_layers, apply_acts=tuple(apply_acts)
    )

    in_specs = [pl.BlockSpec((tm, in_pad), lambda m: (m, 0))]
    operands = [xp]
    for w, b in zip(weights, biases):
        in_specs.append(pl.BlockSpec(w.shape, lambda m: (0, 0)))
        in_specs.append(pl.BlockSpec(b.shape, lambda m: (0, 0)))
        operands.append(w)
        operands.append(b)

    out = pl.pallas_call(
        kernel,
        out_shape=jax.ShapeDtypeStruct((b_pad, out_pad), jnp.float32),
        grid=(b_pad // tm,),
        in_specs=in_specs,
        out_specs=pl.BlockSpec((tm, out_pad), lambda m: (m, 0)),
        compiler_params=pltpu.CompilerParams(
            dimension_semantics=("parallel",)
        ),
    )(*operands)

    # Strip batch / lane padding outside the kernel.
    return out[:B, :out_features]


# ----------------------------------------------------------------------------
# BuildMLP equivalent (activation = Sigmoid).
# ----------------------------------------------------------------------------
class BuildMLP:
    """JAX/Pallas port of the PyTorch BuildMLP (activation = nn.Sigmoid)."""

    def __init__(self, input_features, layers, linear_output=True, key=None):
        self.layers = list(layers)
        self.linear_output = linear_output
        if key is None:
            key = jax.random.PRNGKey(0)

        # f32 params for the pure-JAX reference path.
        self.ref_params = []      # (W_T (in,out) f32, b (out,) f32, apply_act)
        # Padded / bf16 params for the fused kernel.
        self.weights = []         # bf16 (in_pad, out_pad)
        self.biases = []          # f32  (1, out_pad)
        self.apply_acts = []

        in_f = input_features
        for i, out_f in enumerate(self.layers):
            key, wk, bk = jax.random.split(key, 3)
            # PyTorch nn.Linear default init: U(-1/sqrt(in), 1/sqrt(in))
            bound = 1.0 / (in_f ** 0.5)
            w = jax.random.uniform(wk, (out_f, in_f), jnp.float32, -bound, bound)
            b = jax.random.uniform(bk, (out_f,), jnp.float32, -bound, bound)
            apply_act = (i < len(self.layers) - 1) or self.linear_output

            self.ref_params.append((w.T, b, apply_act))

            in_pad = _round_up(in_f, 128)
            out_pad = _round_up(out_f, 128)
            w_t_pad = jnp.zeros((in_pad, out_pad), jnp.float32)
            w_t_pad = w_t_pad.at[:in_f, :out_f].set(w.T)
            b_pad = jnp.zeros((1, out_pad), jnp.float32)
            b_pad = b_pad.at[0, :out_f].set(b)

            self.weights.append(w_t_pad.astype(jnp.bfloat16))
            self.biases.append(b_pad)
            self.apply_acts.append(apply_act)
            in_f = out_f

    def __call__(self, x):
        return _fused_mlp_forward(
            x, self.weights, self.biases, self.apply_acts, self.layers[-1]
        )


# ----------------------------------------------------------------------------
# Pure-JAX f32 reference (true PyTorch semantics) for a correctness check.
# ----------------------------------------------------------------------------
def _reference_forward(mlp: BuildMLP, x):
    y = x
    for w_t, b, apply_act in mlp.ref_params:
        y = y @ w_t + b
        if apply_act:
            y = jax.nn.sigmoid(y)
    return y


if __name__ == "__main__":
    key = jax.random.PRNGKey(0)
    kx, kp = jax.random.split(key)

    batch = 8
    input_features = 32
    layers = [64, 32, 16]

    x = jax.random.normal(kx, (batch, input_features), jnp.float32)

    mlp = BuildMLP(input_features, layers, linear_output=True, key=kp)

    y = mlp(x)
    y = jax.block_until_ready(y)

    y_ref = _reference_forward(mlp, x)
    assert y.shape == (batch, layers[-1])
    # bf16 matmul operands -> allow ~1e-2-level deviation vs the f32 reference.
    assert jnp.allclose(y, y_ref, atol=3e-2, rtol=3e-2), (
        "mismatch vs reference: max abs diff = "
        f"{float(jnp.max(jnp.abs(y - y_ref)))}"
    )

    print("KERNEL_OK")
</pallas_src>

<mosaic_0001>
module attributes {stable_mosaic.version = 11 : i64} {
  func.func @_fused_mlp_kernel(%arg0: i32, %arg1: memref<8x128xbf16, #tpu.memory_space<vmem>>, %arg2: memref<128x128xbf16, #tpu.memory_space<vmem>>, %arg3: memref<1x128xf32, #tpu.memory_space<vmem>>, %arg4: memref<128x128xbf16, #tpu.memory_space<vmem>>, %arg5: memref<1x128xf32, #tpu.memory_space<vmem>>, %arg6: memref<128x128xbf16, #tpu.memory_space<vmem>>, %arg7: memref<1x128xf32, #tpu.memory_space<vmem>>, %arg8: memref<8x128xf32, #tpu.memory_space<vmem>>) attributes {dimension_semantics = [#tpu.dimension_semantics<parallel>], iteration_bounds = array<i64: 1>, scalar_prefetch = 0 : i64, scratch_operands = 0 : i64, tpu.core_type = #tpu.core_type<tc>, window_params = [{transform_indices = @transform_0, window_bounds = array<i64: 8, 128>}, {pipeline_mode = #tpu.pipeline_mode<synchronous>, transform_indices = @transform_1, window_bounds = array<i64: 128, 128>}, {pipeline_mode = #tpu.pipeline_mode<synchronous>, transform_indices = @transform_2, window_bounds = array<i64: 1, 128>}, {pipeline_mode = #tpu.pipeline_mode<synchronous>, transform_indices = @transform_3, window_bounds = array<i64: 128, 128>}, {pipeline_mode = #tpu.pipeline_mode<synchronous>, transform_indices = @transform_4, window_bounds = array<i64: 1, 128>}, {pipeline_mode = #tpu.pipeline_mode<synchronous>, transform_indices = @transform_5, window_bounds = array<i64: 128, 128>}, {pipeline_mode = #tpu.pipeline_mode<synchronous>, transform_indices = @transform_6, window_bounds = array<i64: 1, 128>}, {transform_indices = @transform_7, window_bounds = array<i64: 8, 128>}]} {
    %c0 = arith.constant 0 : index
    %c0_0 = arith.constant 0 : index
    %0 = vector.load %arg1[%c0, %c0_0] : memref<8x128xbf16, #tpu.memory_space<vmem>>, vector<8x128xbf16>
    %c0_1 = arith.constant 0 : index
    %c0_2 = arith.constant 0 : index
    %1 = vector.load %arg2[%c0_1, %c0_2] : memref<128x128xbf16, #tpu.memory_space<vmem>>, vector<128x128xbf16>
    %c0_3 = arith.constant 0 : index
    %c0_4 = arith.constant 0 : index
    %2 = vector.load %arg3[%c0_3, %c0_4] : memref<1x128xf32, #tpu.memory_space<vmem>>, vector<1x128xf32>
    %cst = arith.constant dense<0.000000e+00> : vector<8x128xf32>
    %3 = tpu.matmul %0, %1, %cst {dimension_numbers = #tpu.dot_dimension_numbers<[1], [0], [0], [1], [0, 0, 1, 1], [], []>} : vector<8x128xbf16>, vector<128x128xbf16>, vector<8x128xf32> -> vector<8x128xf32>
    %4 = vector.broadcast %2 : vector<1x128xf32> to vector<8x128xf32>
    %5 = arith.addf %3, %4 : vector<8x128xf32>
    %cst_5 = arith.constant 5.000000e-01 : f32
    %6 = vector.broadcast %cst_5 : f32 to vector<8x128xf32>
    %7 = arith.mulf %6, %5 : vector<8x128xf32>
    %8 = math.tanh %7 : vector<8x128xf32>
    %cst_6 = arith.constant 5.000000e-01 : f32
    %9 = vector.broadcast %cst_6 : f32 to vector<8x128xf32>
    %10 = arith.mulf %9, %8 : vector<8x128xf32>
    %cst_7 = arith.constant 5.000000e-01 : f32
    %11 = vector.broadcast %cst_7 : f32 to vector<8x128xf32>
    %12 = arith.addf %10, %11 : vector<8x128xf32>
    %13 = arith.truncf %12 : vector<8x128xf32> to vector<8x128xbf16>
    %c0_8 = arith.constant 0 : index
    %c0_9 = arith.constant 0 : index
    %14 = vector.load %arg4[%c0_8, %c0_9] : memref<128x128xbf16, #tpu.memory_space<vmem>>, vector<128x128xbf16>
    %c0_10 = arith.constant 0 : index
    %c0_11 = arith.constant 0 : index
    %15 = vector.load %arg5[%c0_10, %c0_11] : memref<1x128xf32, #tpu.memory_space<vmem>>, vector<1x128xf32>
    %cst_12 = arith.constant dense<0.000000e+00> : vector<8x128xf32>
    %16 = tpu.matmul %13, %14, %cst_12 {dimension_numbers = #tpu.dot_dimension_numbers<[1], [0], [0], [1], [0, 0, 1, 1], [], []>} : vector<8x128xbf16>, vector<128x128xbf16>, vector<8x128xf32> -> vector<8x128xf32>
    %17 = vector.broadcast %15 : vector<1x128xf32> to vector<8x128xf32>
    %18 = arith.addf %16, %17 : vector<8x128xf32>
    %cst_13 = arith.constant 5.000000e-01 : f32
    %19 = vector.broadcast %cst_13 : f32 to vector<8x128xf32>
    %20 = arith.mulf %19, %18 : vector<8x128xf32>
    %21 = math.tanh %20 : vector<8x128xf32>
    %cst_14 = arith.constant 5.000000e-01 : f32
    %22 = vector.broadcast %cst_14 : f32 to vector<8x128xf32>
    %23 = arith.mulf %22, %21 : vector<8x128xf32>
    %cst_15 = arith.constant 5.000000e-01 : f32
    %24 = vector.broadcast %cst_15 : f32 to vector<8x128xf32>
    %25 = arith.addf %23, %24 : vector<8x128xf32>
    %26 = arith.truncf %25 : vector<8x128xf32> to vector<8x128xbf16>
    %c0_16 = arith.constant 0 : index
    %c0_17 = arith.constant 0 : index
    %27 = vector.load %arg6[%c0_16, %c0_17] : memref<128x128xbf16, #tpu.memory_space<vmem>>, vector<128x128xbf16>
    %c0_18 = arith.constant 0 : index
    %c0_19 = arith.constant 0 : index
    %28 = vector.load %arg7[%c0_18, %c0_19] : memref<1x128xf32, #tpu.memory_space<vmem>>, vector<1x128xf32>
    %cst_20 = arith.constant dense<0.000000e+00> : vector<8x128xf32>
    %29 = tpu.matmul %26, %27, %cst_20 {dimension_numbers = #tpu.dot_dimension_numbers<[1], [0], [0], [1], [0, 0, 1, 1], [], []>} : vector<8x128xbf16>, vector<128x128xbf16>, vector<8x128xf32> -> vector<8x128xf32>
    %30 = vector.broadcast %28 : vector<1x128xf32> to vector<8x128xf32>
    %31 = arith.addf %29, %30 : vector<8x128xf32>
    %cst_21 = arith.constant 5.000000e-01 : f32
    %32 = vector.broadcast %cst_21 : f32 to vector<8x128xf32>
    %33 = arith.mulf %32, %31 : vector<8x128xf32>
    %34 = math.tanh %33 : vector<8x128xf32>
    %cst_22 = arith.constant 5.000000e-01 : f32
    %35 = vector.broadcast %cst_22 : f32 to vector<8x128xf32>
    %36 = arith.mulf %35, %34 : vector<8x128xf32>
    %cst_23 = arith.constant 5.000000e-01 : f32
    %37 = vector.broadcast %cst_23 : f32 to vector<8x128xf32>
    %38 = arith.addf %36, %37 : vector<8x128xf32>
    %c0_24 = arith.constant 0 : index
    %c0_25 = arith.constant 0 : index
    %39 = vector.load %arg8[%c0_24, %c0_25] : memref<8x128xf32, #tpu.memory_space<vmem>>, vector<8x128xf32>
    tpu.vector_store %arg8[%c0_24, %c0_25], %38 {strides = array<i32>} : memref<8x128xf32, #tpu.memory_space<vmem>>, vector<8x128xf32>,
    return
  }
  func.func @transform_0(%arg0: i32) -> (i32, i32) {
    %c0_i32 = arith.constant 0 : i32
    %c0_i32_0 = arith.constant 0 : i32
    return %arg0, %c0_i32 : i32, i32
  }
  func.func @transform_1(%arg0: i32) -> (i32, i32) {
    %c0_i32 = arith.constant 0 : i32
    %c0_i32_0 = arith.constant 0 : i32
    %c0_i32_1 = arith.constant 0 : i32
    return %c0_i32, %c0_i32_0 : i32, i32
  }
  func.func @transform_2(%arg0: i32) -> (i32, i32) {
    %c0_i32 = arith.constant 0 : i32
    %c0_i32_0 = arith.constant 0 : i32
    %c0_i32_1 = arith.constant 0 : i32
    return %c0_i32, %c0_i32_0 : i32, i32
  }
  func.func @transform_3(%arg0: i32) -> (i32, i32) {
    %c0_i32 = arith.constant 0 : i32
    %c0_i32_0 = arith.constant 0 : i32
    %c0_i32_1 = arith.constant 0 : i32
    return %c0_i32, %c0_i32_0 : i32, i32
  }
  func.func @transform_4(%arg0: i32) -> (i32, i32) {
    %c0_i32 = arith.constant 0 : i32
    %c0_i32_0 = arith.constant 0 : i32
    %c0_i32_1 = arith.constant 0 : i32
    return %c0_i32, %c0_i32_0 : i32, i32
  }
  func.func @transform_5(%arg0: i32) -> (i32, i32) {
    %c0_i32 = arith.constant 0 : i32
    %c0_i32_0 = arith.constant 0 : i32
    %c0_i32_1 = arith.constant 0 : i32
    return %c0_i32, %c0_i32_0 : i32, i32
  }
  func.func @transform_6(%arg0: i32) -> (i32, i32) {
    %c0_i32 = arith.constant 0 : i32
    %c0_i32_0 = arith.constant 0 : i32
    %c0_i32_1 = arith.constant 0 : i32
    return %c0_i32, %c0_i32_0 : i32, i32
  }
  func.func @transform_7(%arg0: i32) -> (i32, i32) {
    %c0_i32 = arith.constant 0 : i32
    %c0_i32_0 = arith.constant 0 : i32
    return %arg0, %c0_i32 : i32, i32
  }
}

</mosaic_0001>

<bundles_post_ra>
// kernel: tpu_custom_call.1
= control target key start
LH: loop header
LB: loop body
LE: loop exit
PB: predicated region body
PF: predicated region fallthrough
CT: control target
= control target key end

     0   :  { %12 = vsyncpa [#allocation3], 0  ;;  %s820_s0 = inlined_call_operand.hbm [shape: bf16[8,128], index: 0, kind: input, shape index: {}]   ;;  %s821_s1 = inlined_call_operand.hbm [shape: bf16[128,128], index: 1, kind: input, shape index: {}]   ;;  %s822_s2 = inlined_call_operand.vmem [shape: f32[1,128], index: 2, kind: input, shape index: {}]   ;;  %s823_s3 = inlined_call_operand.hbm [shape: bf16[128,128], index: 3, kind: input, shape index: {}]   ;;  %s824_s4 = inlined_call_operand.vmem [shape: f32[1,128], index: 4, kind: input, shape index: {}]   ;;  %s825_s5 = inlined_call_operand.hbm [shape: bf16[128,128], index: 5, kind: input, shape index: {}]   ;;  %s826_s6 = inlined_call_operand.vmem [shape: f32[1,128], index: 6, kind: input, shape index: {}]   ;;  %s827_s7 = inlined_call_operand.hbm [shape: f32[8,128], index: 7, kind: output, shape index: {}]  }
   0x1   :  { %13 = vsyncpa [#allocation6], 0 }
   0x2   :  { %14 = vsyncpa [#allocation9], 0 }
   0x3   :  { %15 = vsyncpa [#allocation4], 0  ;;  %s708_s24 = smov [#allocation5]  }
   0x4   :  { %s31_s25 = sshll.u32 %s708_s24, 4  ;;  %s32_s25 = int_to_ptr.vmem [resolvable:$true] %s31_s25 }
   0x5   :  { %s608_s26 = scalar_lea.vmem %s32_s25, 1024  ;;  %p613_p1 = scmp.lt.s32.totalorder %s32_s25, %s32_s25 }
   0x6   :  { %p609_p0 = scmp.ne.s32.totalorder %s32_s25, %s608_s26  ;;  %p614_p2 = scmp.lt.s32.totalorder %s608_s26, %s608_s26 }
   0x8   :  { %p615_p3 = por %p614_p2, %p613_p1 }
   0xa   :  { %p616_p4 = pnand %p615_p3, %p609_p0 }
   0xc   :  { %619 = shalt.err (!%p616_p4)
}
   0xd   :  { %s709_s27 = smov 64   ;;  %s710_s28 = smov 4  }
   0xe   :  { %37 = dma.hbm_to_vmem [thread:$0]  %s821_s1, 1024, %s32_s25, [#allocation6], %s709_s27, %s709_s27, %s710_s28  }
   0xf   :  { %s711_s8 = smov [#allocation2]   ;;  %s712_s10 = smov [#allocation7]  }
  0x10   :  { %s22_s9 = sshll.u32 %s711_s8, 4  ;;  %s45_s11 = sshll.u32 %s712_s10, 4  ;;  %s23_s9 = int_to_ptr.vmem [resolvable:$true] %s22_s9  ;;  %s46_s11 = int_to_ptr.vmem [resolvable:$true] %s45_s11 }
  0x11   :  { %s628_s12 = scalar_lea.vmem %s23_s9, 64  ;;  %p633_p6 = scmp.lt.s32.totalorder %s23_s9, %s23_s9 }
  0x12   :  { %p629_p5 = scmp.ne.s32.totalorder %s23_s9, %s628_s12  ;;  %p634_p7 = scmp.lt.s32.totalorder %s628_s12, %s628_s12 }
  0x14   :  { %p635_p8 = por %p634_p7, %p633_p6 }
  0x16   :  { %p636_p9 = pnand %p635_p8, %p629_p5 }
  0x18   :  { %639 = shalt.err (!%p636_p9)
}
  0x19   :  { %25 = dma.hbm_to_vmem [thread:$0]  %s820_s0, 64, %s23_s9, [#allocation3]  }
  0x1a   :  { %s648_s15 = scalar_lea.vmem %s46_s11, 1024  ;;  %p653_p11 = scmp.lt.s32.totalorder %s46_s11, %s46_s11 }
  0x1b   :  { %p649_p10 = scmp.ne.s32.totalorder %s46_s11, %s648_s15  ;;  %p654_p12 = scmp.lt.s32.totalorder %s648_s15, %s648_s15 }
  0x1d   :  { %p655_p13 = por %p654_p12, %p653_p11 }
  0x1f   :  { %p656_p0 = pnand %p655_p13, %p649_p10 }
  0x21   :  { %659 = shalt.err (!%p656_p0)
}
  0x22   :  { %51 = dma.hbm_to_vmem [thread:$0]  %s823_s3, 1024, %s46_s11, [#allocation6], %s709_s27, %s709_s27, %s710_s28  }
  0x23   :  { %s713_s17 = smov [#allocation8]  }
  0x24   :  { %s59_s18 = sshll.u32 %s713_s17, 4  ;;  %s60_s18 = int_to_ptr.vmem [resolvable:$true] %s59_s18 }
  0x25   :  { %s668_s19 = scalar_lea.vmem %s60_s18, 1024  ;;  %p673_p2 = scmp.lt.s32.totalorder %s60_s18, %s60_s18 }
  0x26   :  { %p669_p1 = scmp.ne.s32.totalorder %s60_s18, %s668_s19  ;;  %p674_p3 = scmp.lt.s32.totalorder %s668_s19, %s668_s19 }
  0x28   :  { %p675_p4 = por %p674_p3, %p673_p2 }
  0x2a   :  { %p676_p5 = pnand %p675_p4, %p669_p1 }
  0x2c   :  { %679 = shalt.err (!%p676_p5)
}
  0x2d   :  { %65 = dma.hbm_to_vmem [thread:$0]  %s825_s5, 1024, %s60_s18, [#allocation9], %s709_s27, %s709_s27, %s710_s28  }
  0x2e   :  { %700 = dma.done.wait [#allocation3], 64  }
  0x2f   :  { %701 = vsyncadd [#allocation3], 4294967232 }
  0x30   :  { %702 = dma.done.wait [#allocation6], 2048  }
  0x31   :  { %703 = vsyncadd [#allocation6], 4294965248 }
  0x32   :  { %704 = dma.done.wait [#allocation9], 1024  }
  0x33   :  { %705 = vsyncadd [#allocation9], 4294966272  ;;  %v714_v0 = vmov 0.0   ;;  %vm715_vm0 = vmmov 0   ;;  %v570_v1 = vld [vmem:[#allocation5 + $0x38] sm:$0xff]   ;;  %v571_v2 = vld [vmem:[#allocation5 + $0x30] sm:$0xff]  }
  0x34   :  { %501 = vmatprep.subr.bf16.mxu0 %v714_v0  ;;  %517 = vmatprep.mubr.msk.bf16.mxu0 %vm715_vm0, %v714_v0  ;;  %v572_v3 = vld [vmem:[#allocation5 + $0x28] sm:$0xff]   ;;  %v578_v4 = vld [vmem:[#allocation7 + $0x38] sm:$0xff]   ;;  %v573_v5 = vld [vmem:[#allocation5 + $0x20] sm:$0xff]  }
  0x35   :  { %521 = vmatprep.subr.bf16.mxu1 %v714_v0  ;;  %537 = vmatprep.mubr.msk.bf16.mxu1 %vm715_vm0, %v714_v0  ;;  %v579_v6 = vld [vmem:[#allocation7 + $0x30] sm:$0xff]   ;;  %v574_v7 = vld [vmem:[#allocation5 + $0x18] sm:$0xff]   ;;  %v576_v9 = vld [vmem:[#allocation5 + $0x8] sm:$0xff]  }
  0x36   :  { %502 = vmatpush3.bf16.msra.mxu0 %v570_v1  ;;  %522 = vmatpush3.bf16.msra.mxu1 %v578_v4  ;;  %v575_v8 = vld [vmem:[#allocation5 + $0x10] sm:$0xff]   ;;  %v577_v10 = vld [vmem:[#allocation5] sm:$0xff]   ;;  %v81_v11 = vld [vmem:[#allocation2] sm:$0xf] }
  0x37   :  { %503 = vmatprep.subr.bf16.mxu0 %v714_v0  ;;  %523 = vmatprep.subr.bf16.mxu1 %v714_v0  ;;  %v580_v12 = vld [vmem:[#allocation7 + $0x28] sm:$0xff]   ;;  %v581_v13 = vld [vmem:[#allocation7 + $0x20] sm:$0xff]   ;;  %v582_v14 = vld [vmem:[#allocation7 + $0x18] sm:$0xff]  }
  0x38   :  { %v583_v15 = vld [vmem:[#allocation7 + $0x10] sm:$0xff]   ;;  %v584_v16 = vld [vmem:[#allocation7 + $0x8] sm:$0xff]   ;;  %v585_v17 = vld [vmem:[#allocation7] sm:$0xff]  }
  0x39   :  { %v586_v18 = vld [vmem:[#allocation8 + $0x38] sm:$0xff]   ;;  %v587_v19 = vld [vmem:[#allocation8 + $0x30] sm:$0xff]   ;;  %v588_v31 = vld [vmem:[#allocation8 + $0x28] sm:$0xff]  }
  0x3a   :  { %504 = vmatpush3.bf16.msra.mxu0 %v571_v2  ;;  %524 = vmatpush3.bf16.msra.mxu1 %v579_v6  ;;  %v447_v20 = vld [vmem:[%s822_s2] ss:$0 sm:$0xff]  ;;  %v589_v32 = vld [vmem:[#allocation8 + $0x20] sm:$0xff]   ;;  %v591_v34 = vld [vmem:[#allocation8 + $0x10] sm:$0xff]  }
  0x3b   :  { %505 = vmatprep.subr.bf16.mxu0 %v714_v0  ;;  %525 = vmatprep.subr.bf16.mxu1 %v714_v0  ;;  %v590_v33 = vld [vmem:[#allocation8 + $0x18] sm:$0xff]   ;;  %v592_v35 = vld [vmem:[#allocation8 + $0x8] sm:$0xff]   ;;  %v593_v36 = vld [vmem:[#allocation8] sm:$0xff]  }
  0x3c   :  { %v456_v37 = vld [vmem:[%s824_s4] ss:$0 sm:$0xff]  ;;  %s716_s4 = smov [#allocation10]  }
  0x3d   :  { %v465_v48 = vld [vmem:[%s826_s6] ss:$0 sm:$0xff]  ;;  %s436_s24 = sshll.u32 %s716_s4, 4  ;;  %s437_s24 = int_to_ptr.vmem [resolvable:$true] %s436_s24 }
  0x3e   :  { %506 = vmatpush3.bf16.msra.mxu0 %v572_v3  ;;  %526 = vmatpush3.bf16.msra.mxu1 %v580_v12  ;;  %s680_s25 = scalar_lea.vmem %s437_s24, 128  ;;  %p685_p7 = scmp.lt.s32.totalorder %s437_s24, %s437_s24 }
  0x3f   :  { %507 = vmatprep.subr.bf16.mxu0 %v714_v0  ;;  %527 = vmatprep.subr.bf16.mxu1 %v714_v0  ;;  %p681_p6 = scmp.ne.s32.totalorder %s437_s24, %s680_s25  ;;  %p686_p8 = scmp.lt.s32.totalorder %s680_s25, %s680_s25 }
  0x41   :  { %p687_p9 = por %p686_p8, %p685_p7 }
  0x42   :  { %508 = vmatpush3.bf16.msra.mxu0 %v573_v5  ;;  %528 = vmatpush3.bf16.msra.mxu1 %v581_v13 }
  0x43   :  { %509 = vmatprep.subr.bf16.mxu0 %v714_v0  ;;  %529 = vmatprep.subr.bf16.mxu1 %v714_v0  ;;  %p688_p10 = pnand %p687_p9, %p681_p6 }
  0x46   :  { %510 = vmatpush3.bf16.msra.mxu0 %v574_v7  ;;  %530 = vmatpush3.bf16.msra.mxu1 %v582_v14 }
  0x47   :  { %511 = vmatprep.subr.bf16.mxu0 %v714_v0  ;;  %531 = vmatprep.subr.bf16.mxu1 %v714_v0 }
  0x4a   :  { %512 = vmatpush3.bf16.msra.mxu0 %v575_v8  ;;  %532 = vmatpush3.bf16.msra.mxu1 %v583_v15 }
  0x4b   :  { %513 = vmatprep.subr.bf16.mxu0 %v714_v0  ;;  %533 = vmatprep.subr.bf16.mxu1 %v714_v0 }
  0x4e   :  { %514 = vmatpush3.bf16.msra.mxu0 %v576_v9  ;;  %534 = vmatpush3.bf16.msra.mxu1 %v584_v16 }
  0x4f   :  { %515 = vmatprep.subr.bf16.mxu0 %v714_v0  ;;  %535 = vmatprep.subr.bf16.mxu1 %v714_v0 }
  0x52   :  { %516 = vmatpush3.bf16.msra.mxu0 %v577_v10  ;;  %536 = vmatpush3.bf16.msra.mxu1 %v585_v17 }
  0x53   :  { %541 = vmatprep.subr.bf16.mxu0 %v714_v0 }
  0x55   :  { %518 = vmatmul.mubr.bf16.vlgmr.msra.gmra.mxu0 %v81_v11 }
  0x56   :  { %557 = vmatprep.mubr.msk.bf16.mxu0 %vm715_vm0, %v714_v0  ;;  %542 = vmatpush3.bf16.msra.mxu0 %v586_v18 }
  0x57   :  { %543 = vmatprep.subr.bf16.mxu0 %v714_v0 }
  0x5a   :  { %544 = vmatpush3.bf16.msra.mxu0 %v587_v19 }
  0x5b   :  { %545 = vmatprep.subr.bf16.mxu0 %v714_v0 }
  0x5e   :  { %546 = vmatpush3.bf16.msra.mxu0 %v588_v31 }
  0x5f   :  { %547 = vmatprep.subr.bf16.mxu0 %v714_v0 }
  0x62   :  { %548 = vmatpush3.bf16.msra.mxu0 %v589_v32 }
  0x63   :  { %549 = vmatprep.subr.bf16.mxu0 %v714_v0 }
  0x66   :  { %550 = vmatpush3.bf16.msra.mxu0 %v590_v33 }
  0x67   :  { %551 = vmatprep.subr.bf16.mxu0 %v714_v0 }
  0x6a   :  { %552 = vmatpush3.bf16.msra.mxu0 %v591_v34 }
  0x6b   :  { %553 = vmatprep.subr.bf16.mxu0 %v714_v0 }
  0x6e   :  { %554 = vmatpush3.bf16.msra.mxu0 %v592_v35 }
  0x6f   :  { %555 = vmatprep.subr.bf16.mxu0 %v714_v0 }
  0x72   :  { %556 = vmatpush3.bf16.msra.mxu0 %v593_v36 }
 0x115   :  { %v187_v21 = vpop.f32.mrf.mxu0 }
 0x116   :  { %v188_v22 = vadd.f32 %v447_v20, %v187_v21 }
 0x117   :  { %v519_v23 = vpop.f32.mrf.mxu0 }
 0x118   :  { %v193_v24 = vmul.f32 0.5, %v188_v22 }
 0x119   :  { %v190_v25 = vpop.f32.mrf.mxu0 }
 0x11a   :  { %594 = vtanh.f32 %v193_v24 }
 0x11b   :  { %v520_v26 = vpop.f32.mrf.mxu0 }
 0x127   :  { %v595_v27 = vpop.eup %594 }
 0x128   :  { %v195_v28 = vmul.f32 0.5, %v595_v27 }
 0x12a   :  { %v196_v29 = vadd.f32 0.5, %v195_v28 }
 0x12c   :  { %v197_v30 = vpack.c.bf16 %v196_v29, %v196_v29 }
 0x12e   :  { %538 = vmatmul.mubr.bf16.vlgmr.msra.gmra.mxu1 %v197_v30 }
 0x1ee   :  { %v303_v38 = vpop.f32.mrf.mxu1 }
 0x1ef   :  { %v304_v39 = vadd.f32 %v456_v37, %v303_v38 }
 0x1f0   :  { %v539_v40 = vpop.f32.mrf.mxu1 }
 0x1f1   :  { %v309_v41 = vmul.f32 0.5, %v304_v39 }
 0x1f2   :  { %v306_v42 = vpop.f32.mrf.mxu1 }
 0x1f3   :  { %596 = vtanh.f32 %v309_v41 }
 0x1f4   :  { %v540_v43 = vpop.f32.mrf.mxu1 }
 0x200   :  { %v597_v44 = vpop.eup %596 }
 0x201   :  { %v311_v45 = vmul.f32 0.5, %v597_v44 }
 0x203   :  { %v312_v46 = vadd.f32 0.5, %v311_v45 }
 0x205   :  { %v313_v47 = vpack.c.bf16 %v312_v46, %v312_v46 }
 0x207   :  { %558 = vmatmul.mubr.bf16.vlgmr.msra.gmra.mxu0 %v313_v47 }
 0x2c7   :  { %v419_v49 = vpop.f32.mrf.mxu0 }
 0x2c8   :  { %v420_v50 = vadd.f32 %v465_v48, %v419_v49 }
 0x2c9   :  { %v559_v51 = vpop.f32.mrf.mxu0 }
 0x2ca   :  { %v425_v52 = vmul.f32 0.5, %v420_v50 }
 0x2cb   :  { %v422_v53 = vpop.f32.mrf.mxu0 }
 0x2cc   :  { %598 = vtanh.f32 %v425_v52 }
 0x2cd   :  { %v560_v54 = vpop.f32.mrf.mxu0 }
 0x2d9   :  { %v599_v55 = vpop.eup %598 }
 0x2da   :  { %v427_v56 = vmul.f32 0.5, %v599_v55 }
 0x2dc   :  { %v428_v57 = vadd.f32 0.5, %v427_v56 }
 0x2de   :  { %429 = vst [vmem:[#allocation10] sm:$0xff] %v428_v57 }
 0x2df   :  { %691 = shalt.err (!%p688_p10)
}
 0x2e0   :  { %439 = dma.vmem_to_hbm [thread:$0]  %s437_s24, 128, %s827_s7, [#allocation4]  }
 0x2e1   :  { %706 = dma.done.wait [#allocation4], 128  }
 0x2e2   :  { %707 = vsyncadd [#allocation4], 4294967168 }
 0x2e3   :  { %443 = vsyncpa [#allocation3], 1 }
 0x2e4   :  { %444 = vsyncpa [#allocation6], 1 }
 0x2e5   :  { %445 = vsyncpa [#allocation9], 1 }
 0x2e6   :  { %446 = vsyncpa [#allocation4], 1 }

</bundles_post_ra>
